<compile_context>
chip_gen: v7x
topology: tpu7x:2x2x1
jax: 0.10.0
libtpu: 0.0.40
codegen_flags: <defaults>
</compile_context>

<pallas_src>
import functools

import jax
import jax.numpy as jnp
from jax.experimental import pallas as pl
from jax.experimental.pallas import tpu as pltpu


def _round_up(x, m):
    return ((x + m - 1) // m) * m


def _choose_tiles(mp, dp, itemsize, budget_bytes=20 << 20):
    """Pick (TM, TC) dividing mp, lane-dense, under a conservative VMEM budget."""

    def vmem_bytes(tm, tc):
        # double-buffered row & column input streams + f32 sim tile + scratch/out
        return 2 * (tm + tc) * dp * itemsize + tm * tc * 4 + 4 * tm * 4

    # Row tile: prefer >= 2 row tiles so the "parallel" axis can use both
    # TensorCores on v7x.  mp is always a multiple of 128 here.
    tm = 128
    for t in (256, 128, 64):
        if mp % t == 0 and mp // t >= 2:
            tm = t
            break

    # Column tile: biggest lane-dense tile that fits the budget.
    tc = min(mp, 128)
    for t in (512, 256, 128):
        if mp % t == 0 and vmem_bytes(tm, t) <= budget_bytes:
            tc = t
            break

    # Huge feature dims: shrink the row tile rather than blow VMEM.
    while vmem_bytes(tm, tc) > budget_bytes and tm > 8:
        tm //= 2
    return tm, tc


def _nt_xent_lse_kernel(p_row_ref, p_col_ref, lse_ref, l_scr,
                        *, inv_temp, tm, tc, m_real):
    """One (row_tile, col_tile) step of the masked logsumexp sweep.

    p_row_ref : (TM, Dp)  normalized rows (bf16), row operand
    p_col_ref : (TC, Dp)  normalized rows (bf16), column operand
    lse_ref   : (TM, 1)   per-row logsumexp over off-diagonal columns (f32)
    l_scr     : (TM, 1)   running sum of exp(sim - inv_temp) (f32)
    """
    i = pl.program_id(0)
    j = pl.program_id(1)
    nj = pl.num_programs(1)
    inv_t = jnp.float32(inv_temp)

    @pl.when(j == 0)
    def _():
        l_scr[...] = jnp.zeros_like(l_scr)

    # Fold inv_temp into the (smaller) row operand; keep the MXU feed in bf16.
    q = (p_row_ref[...].astype(jnp.float32) * inv_t).astype(p_col_ref.dtype)
    k = p_col_ref[...]

    # sim = (q . k^T) = inv_temp * cos ; contract last dims directly (no k.T copy).
    sim = jax.lax.dot_general(
        q, k, dimension_numbers=(((1,), (1,)), ((), ())),
        preferred_element_type=jnp.float32)                      # (TM, TC)

    # Static shift: cos <= 1  =>  sim <= inv_temp  =>  exp(sim - inv_temp) <= 1.
    # (Safe for any reasonable SimCLR temperature; avoids the online max.)
    e = jnp.exp(sim - inv_t)

    row0 = i * tm
    col0 = j * tc
    # Only tiles touching the diagonal or the padded tail columns need a mask.
    needs_mask = jnp.logical_or(
        jnp.logical_and(row0 < col0 + tc, col0 < row0 + tm),    # diag intersect
        col0 + tc > m_real)                                      # padded columns

    @pl.when(needs_mask)
    def _():
        rows = row0 + jax.lax.broadcasted_iota(jnp.int32, (tm, tc), 0)
        cols = col0 + jax.lax.broadcasted_iota(jnp.int32, (tm, tc), 1)
        keep = jnp.logical_and(rows != cols, cols < m_real)
        l_scr[...] += jnp.sum(jnp.where(keep, e, jnp.float32(0.0)),
                              axis=-1, keepdims=True)

    @pl.when(jnp.logical_not(needs_mask))
    def _():
        l_scr[...] += jnp.sum(e, axis=-1, keepdims=True)

    @pl.when(j == nj - 1)
    def _():
        lse_ref[...] = inv_t + jnp.log(l_scr[...])


def nt_xent_loss(z_i, z_j, temperature, mask=None, *, mxu_dtype=jnp.bfloat16):
    """NT-Xent loss.  `mask` is accepted for API parity but unused: the kernel
    realizes the standard SimCLR mask (exclude diagonal; the positive column
    appearing once equals logsumexp([pos, negatives])) algebraically."""
    del mask
    N, D = z_i.shape
    M = 2 * N
    inv_temp = 1.0 / float(temperature)

    p = jnp.concatenate([z_i, z_j], axis=0).astype(jnp.float32)      # (M, D)

    # L2-normalize ONCE (f32).  torch's CosineSimilarity clamps ||a||*||b|| at
    # 1e-8; clamping each ||x|| at 1e-8 is identical for non-degenerate rows.
    nrm2 = jnp.sum(p * p, axis=-1, keepdims=True)
    p_n = p * jax.lax.rsqrt(jnp.maximum(nrm2, jnp.float32(1e-16)))

    # Positives: cos(p_i, p_{(i+N) mod 2N}) / T  -- O(M*D) wrapper glue, keeps
    # the kernel free of a third DMA stream.
    pos = jnp.sum(p_n * jnp.roll(p_n, N, axis=0), axis=-1) * jnp.float32(inv_temp)

    # Lane-dense feature dim and sublane/lane-dense row count (zero rows /
    # columns change neither dots nor norms; padded columns are masked
    # in-kernel and padded rows are dropped from the final sum).
    Dp = max(_round_up(D, 128), 128)
    Mp = max(_round_up(M, 128), 128)
    p_k = p_n.astype(mxu_dtype)
    if Dp != D or Mp != M:
        p_k = jnp.pad(p_k, ((0, Mp - M), (0, Dp - D)))

    TM, TC = _choose_tiles(Mp, Dp, jnp.dtype(mxu_dtype).itemsize)
    grid = (Mp // TM, Mp // TC)

    kernel = functools.partial(_nt_xent_lse_kernel, inv_temp=inv_temp,
                               tm=TM, tc=TC, m_real=M)

    lse = pl.pallas_call(
        kernel,
        out_shape=jax.ShapeDtypeStruct((Mp, 1), jnp.float32),
        grid_spec=pltpu.PrefetchScalarGridSpec(
            num_scalar_prefetch=0,
            grid=grid,
            in_specs=[
                pl.BlockSpec((TM, Dp), lambda i, j: (i, 0)),   # row operand
                pl.BlockSpec((TC, Dp), lambda i, j: (j, 0)),   # column operand
            ],
            out_specs=pl.BlockSpec((TM, 1), lambda i, j: (i, 0)),
            scratch_shapes=[pltpu.VMEM((TM, 1), jnp.float32)],  # running sum-exp
        ),
        compiler_params=pltpu.CompilerParams(
            dimension_semantics=("parallel", "arbitrary"),
            vmem_limit_bytes=32 * 1024 * 1024),
    )(p_k, p_k)

    # CrossEntropy(reduction='sum') / (2N), dropping padded rows.
    per_row = lse[:M, 0] - pos
    return jnp.sum(per_row) / jnp.float32(M)


def mask_correlated_samples(batch_size):
    """Standard SimCLR mask (only used by the reference check below)."""
    M = 2 * batch_size
    m = jnp.ones((M, M), dtype=bool)
    m = m.at[jnp.arange(M), jnp.arange(M)].set(False)
    idx = jnp.arange(batch_size)
    m = m.at[idx, idx + batch_size].set(False)
    m = m.at[idx + batch_size, idx].set(False)
    return m


if __name__ == "__main__":
    key = jax.random.PRNGKey(0)
    N, D = 4, 32
    temperature = 0.5

    k1, k2 = jax.random.split(key)
    z_i = jax.random.normal(k1, (N, D), dtype=jnp.float32)
    z_j = jax.random.normal(k2, (N, D), dtype=jnp.float32)

    loss = nt_xent_loss(z_i, z_j, temperature)
    jax.block_until_ready(loss)

    # Pure-JAX reference replicating the PyTorch forward exactly (f32).
    mask = mask_correlated_samples(N)
    p = jnp.concatenate([z_i, z_j], axis=0)
    M = 2 * N
    dots = jnp.dot(p, p.T, precision=jax.lax.Precision.HIGHEST)
    nrm = jnp.sqrt(jnp.sum(p * p, axis=-1, keepdims=True))
    sim = dots / jnp.maximum(nrm * nrm.T, 1e-8) / temperature
    pos = jnp.concatenate([jnp.diag(sim, N), jnp.diag(sim, -N)])
    negs = sim[mask].reshape(M, M - 2)
    logits = jnp.concatenate([pos[:, None], negs], axis=1)
    ref = jnp.sum(jax.nn.logsumexp(logits, axis=-1) - logits[:, 0]) / M

    # bf16 MXU feed -> ~1e-3..1e-2 agreement with the f32 reference.
    assert jnp.allclose(loss, ref, rtol=2e-2, atol=2e-2), (loss, ref)
    print("KERNEL_OK")
</pallas_src>

<mosaic_0001>
module attributes {stable_mosaic.version = 11 : i64} {
  func.func @_nt_xent_lse_kernel(%arg0: i32, %arg1: i32, %arg2: memref<64x128xbf16, #tpu.memory_space<vmem>>, %arg3: memref<128x128xbf16, #tpu.memory_space<vmem>>, %arg4: memref<64x1xf32, #tpu.memory_space<vmem>>, %arg5: memref<64x1xf32, #tpu.memory_space<vmem>>) attributes {dimension_semantics = [#tpu.dimension_semantics<parallel>, #tpu.dimension_semantics<arbitrary>], iteration_bounds = array<i64: 2, 1>, scalar_prefetch = 0 : i64, scratch_operands = 1 : i64, tpu.core_type = #tpu.core_type<tc>, window_params = [{transform_indices = @transform_0, window_bounds = array<i64: 64, 128>}, {transform_indices = @transform_1, window_bounds = array<i64: 128, 128>}, {transform_indices = @transform_2, window_bounds = array<i64: 64, 1>}]} {
    %c0_i32 = arith.constant 0 : i32
    %0 = arith.cmpi eq, %arg1, %c0_i32 : i32
    %1 = arith.extui %0 : i1 to i32
    %c0_i32_0 = arith.constant 0 : i32
    %2 = arith.cmpi ne, %1, %c0_i32_0 : i32
    scf.if %2 {
      %cst_14 = arith.constant 0.000000e+00 : f32
      %31 = vector.broadcast %cst_14 : f32 to vector<64x1xf32>
      %c0_15 = arith.constant 0 : index
      %c0_16 = arith.constant 0 : index
      %32 = vector.load %arg5[%c0_15, %c0_16] : memref<64x1xf32, #tpu.memory_space<vmem>>, vector<64x1xf32>
      tpu.vector_store %arg5[%c0_15, %c0_16], %31 {strides = array<i32>} : memref<64x1xf32, #tpu.memory_space<vmem>>, vector<64x1xf32>,
    } else {
    }
    %c0 = arith.constant 0 : index
    %c0_1 = arith.constant 0 : index
    %3 = vector.load %arg2[%c0, %c0_1] : memref<64x128xbf16, #tpu.memory_space<vmem>>, vector<64x128xbf16>
    %4 = arith.extf %3 : vector<64x128xbf16> to vector<64x128xf32>
    %cst = arith.constant 2.000000e+00 : f32
    %5 = vector.broadcast %cst : f32 to vector<64x128xf32>
    %6 = arith.mulf %4, %5 : vector<64x128xf32>
    %7 = arith.truncf %6 : vector<64x128xf32> to vector<64x128xbf16>
    %c0_2 = arith.constant 0 : index
    %c0_3 = arith.constant 0 : index
    %8 = vector.load %arg3[%c0_2, %c0_3] : memref<128x128xbf16, #tpu.memory_space<vmem>>, vector<128x128xbf16>
    %cst_4 = arith.constant dense<0.000000e+00> : vector<64x128xf32>
    %9 = tpu.matmul %7, %8, %cst_4 {dimension_numbers = #tpu.dot_dimension_numbers<[1], [1], [0], [0], [0, 0, 1, 0], [], []>} : vector<64x128xbf16>, vector<128x128xbf16>, vector<64x128xf32> -> vector<64x128xf32>
    %cst_5 = arith.constant 2.000000e+00 : f32
    %10 = vector.broadcast %cst_5 : f32 to vector<64x128xf32>
    %11 = arith.subf %9, %10 : vector<64x128xf32>
    %12 = math.exp %11 : vector<64x128xf32>
    %c64_i32 = arith.constant 64 : i32
    %13 = arith.muli %arg0, %c64_i32 : i32
    %c128_i32 = arith.constant 128 : i32
    %14 = arith.muli %arg1, %c128_i32 : i32
    %c128_i32_6 = arith.constant 128 : i32
    %15 = arith.addi %14, %c128_i32_6 : i32
    %16 = arith.cmpi slt, %13, %15 : i32
    %c64_i32_7 = arith.constant 64 : i32
    %17 = arith.addi %13, %c64_i32_7 : i32
    %18 = arith.cmpi slt, %14, %17 : i32
    %19 = arith.andi %16, %18 : i1
    %c128_i32_8 = arith.constant 128 : i32
    %20 = arith.addi %14, %c128_i32_8 : i32
    %c8_i32 = arith.constant 8 : i32
    %21 = arith.cmpi sgt, %20, %c8_i32 : i32
    %22 = arith.ori %19, %21 : i1
    %23 = arith.extui %22 : i1 to i32
    %c0_i32_9 = arith.constant 0 : i32
    %24 = arith.cmpi ne, %23, %c0_i32_9 : i32
    scf.if %24 {
      %31 = tpu.iota {dimensions = array<i32: 0>} : vector<64x128xi32>
      %32 = vector.broadcast %13 : i32 to vector<64x128xi32>
      %33 = arith.addi %32, %31 : vector<64x128xi32>
      %34 = tpu.iota {dimensions = array<i32: 1>} : vector<64x128xi32>
      %35 = vector.broadcast %14 : i32 to vector<64x128xi32>
      %36 = arith.addi %35, %34 : vector<64x128xi32>
      %37 = arith.cmpi ne, %33, %36 : vector<64x128xi32>
      %c8_i32_14 = arith.constant 8 : i32
      %38 = vector.broadcast %c8_i32_14 : i32 to vector<64x128xi32>
      %39 = arith.cmpi slt, %36, %38 : vector<64x128xi32>
      %40 = arith.andi %37, %39 : vector<64x128xi1>
      %c0_15 = arith.constant 0 : index
      %c0_16 = arith.constant 0 : index
      %41 = vector.load %arg5[%c0_15, %c0_16] : memref<64x1xf32, #tpu.memory_space<vmem>>, vector<64x1xf32>
      %cst_17 = arith.constant 0.000000e+00 : f32
      %42 = vector.broadcast %cst_17 : f32 to vector<64x128xf32>
      %43 = arith.select %40, %12, %42 : vector<64x128xi1>, vector<64x128xf32>
      %cst_18 = arith.constant dense<0.000000e+00> : vector<64xf32>
      %44 = vector.multi_reduction <add>, %43, %cst_18 [1] : vector<64x128xf32> to vector<64xf32>
      %45 = vector.shape_cast %44 : vector<64xf32> to vector<64x1xf32>
      %46 = arith.addf %41, %45 : vector<64x1xf32>
      %c0_19 = arith.constant 0 : index
      %c0_20 = arith.constant 0 : index
      %47 = vector.load %arg5[%c0_19, %c0_20] : memref<64x1xf32, #tpu.memory_space<vmem>>, vector<64x1xf32>
      tpu.vector_store %arg5[%c0_19, %c0_20], %46 {strides = array<i32>} : memref<64x1xf32, #tpu.memory_space<vmem>>, vector<64x1xf32>,
    } else {
    }
    %true = arith.constant true
    %25 = arith.xori %22, %true : i1
    %26 = arith.extui %25 : i1 to i32
    %c0_i32_10 = arith.constant 0 : i32
    %27 = arith.cmpi ne, %26, %c0_i32_10 : i32
    scf.if %27 {
      %c0_14 = arith.constant 0 : index
      %c0_15 = arith.constant 0 : index
      %31 = vector.load %arg5[%c0_14, %c0_15] : memref<64x1xf32, #tpu.memory_space<vmem>>, vector<64x1xf32>
      %cst_16 = arith.constant dense<0.000000e+00> : vector<64xf32>
      %32 = vector.multi_reduction <add>, %12, %cst_16 [1] : vector<64x128xf32> to vector<64xf32>
      %33 = vector.shape_cast %32 : vector<64xf32> to vector<64x1xf32>
      %34 = arith.addf %31, %33 : vector<64x1xf32>
      %c0_17 = arith.constant 0 : index
      %c0_18 = arith.constant 0 : index
      %35 = vector.load %arg5[%c0_17, %c0_18] : memref<64x1xf32, #tpu.memory_space<vmem>>, vector<64x1xf32>
      tpu.vector_store %arg5[%c0_17, %c0_18], %34 {strides = array<i32>} : memref<64x1xf32, #tpu.memory_space<vmem>>, vector<64x1xf32>,
    } else {
    }
    %c0_i32_11 = arith.constant 0 : i32
    %28 = arith.cmpi eq, %arg1, %c0_i32_11 : i32
    %29 = arith.extui %28 : i1 to i32
    %cst_12 = arith.constant 2.000000e+00 : f32
    %c0_i32_13 = arith.constant 0 : i32
    %30 = arith.cmpi ne, %29, %c0_i32_13 : i32
    scf.if %30 {
      %c0_14 = arith.constant 0 : index
      %c0_15 = arith.constant 0 : index
      %31 = vector.load %arg5[%c0_14, %c0_15] : memref<64x1xf32, #tpu.memory_space<vmem>>, vector<64x1xf32>
      %32 = math.log %31 : vector<64x1xf32>
      %33 = vector.broadcast %cst_12 : f32 to vector<64x1xf32>
      %34 = arith.addf %33, %32 : vector<64x1xf32>
      %c0_16 = arith.constant 0 : index
      %c0_17 = arith.constant 0 : index
      %35 = vector.load %arg4[%c0_16, %c0_17] : memref<64x1xf32, #tpu.memory_space<vmem>>, vector<64x1xf32>
      tpu.vector_store %arg4[%c0_16, %c0_17], %34 {strides = array<i32>} : memref<64x1xf32, #tpu.memory_space<vmem>>, vector<64x1xf32>,
    } else {
    }
    return
  }
  func.func @transform_0(%arg0: i32, %arg1: i32) -> (i32, i32) {
    %c0_i32 = arith.constant 0 : i32
    %c0_i32_0 = arith.constant 0 : i32
    return %arg0, %c0_i32 : i32, i32
  }
  func.func @transform_1(%arg0: i32, %arg1: i32) -> (i32, i32) {
    %c0_i32 = arith.constant 0 : i32
    %c0_i32_0 = arith.constant 0 : i32
    return %arg1, %c0_i32 : i32, i32
  }
  func.func @transform_2(%arg0: i32, %arg1: i32) -> (i32, i32) {
    %c0_i32 = arith.constant 0 : i32
    %c0_i32_0 = arith.constant 0 : i32
    return %arg0, %c0_i32 : i32, i32
  }
}

</mosaic_0001>

<bundles_post_ra>
// kernel: tpu_custom_call.1
= control target key start
LH: loop header
LB: loop body
LE: loop exit
PB: predicated region body
PF: predicated region fallthrough
CT: control target
= control target key end

     0   :  { %7 = vsyncpa [#allocation4], 0  ;;  %s1259_s0 = inlined_call_operand.hbm [shape: bf16[128,128], index: 0, kind: input, shape index: {}]   ;;  %s1260_s1 = inlined_call_operand.hbm [shape: bf16[128,128], index: 1, kind: input, shape index: {}]   ;;  %s1261_s2 = inlined_call_operand.vmem [shape: f32[128,1], index: 2, kind: output, shape index: {}]  }
   0x1   :  { %9 = vsyncpa [#allocation4 + $0x1], 0 }
   0x2   :  { %10 = vsyncpa [#allocation6], 0  ;;  %s1022_s9 = smov 0   ;;  %s1024_s10 = smov 0  }
   0x3   :  { %s1026_s11 = smov 0   ;;  %s1028_s12 = smov 0  }
   0x4   :  { %s1030_s13 = smov 0   ;;  %s1032_s14 = smov 0  }
   0x5 LB: > { %s674_s15 = sadd.s32 4294967295, %s1000_s14   ;;  %p48_p0 = scmp.ne.s32.totalorder %s984_s10, %s980_s9  ;;  %s1000_s14 = sphi %s1032_s14, %s16_s14   ;;  %s996_s13 = sphi %s1030_s13, %s1280_s13   ;;  %s992_s12 = sphi %s1028_s12, %s1279_s12   ;;  %s988_s11 = sphi %s1026_s11, %s1278_s11   ;;  %s984_s10 = sphi %s1024_s10, %s1277_s10   ;;  %s980_s9 = sphi %s1022_s9, %s1276_s9  }
   0x6   : > { %p1052_p1 = scmp.eq.s32.totalorder %s674_s15, 0  ;;  %p676_p2 = scmp.ge.s32.totalorder %s1000_s14, 1 }
   0x7   : > { %p111_p3 = scmp.lt.s32.totalorder %s1000_s14, 3  ;;  %s1002_s19 = smov [#allocation5]  }
   0x8   : > { %s1266_s16 = scalar_select %p1052_p1, 1, 0 }
   0x9   : > { %p1060_p4 = por %p1052_p1, %p48_p0  ;;  %p1064_p5 = pnand %p676_p2, %p111_p3 }
   0xa   : > { %s126_s20 = sshll.u32 %s1002_s19, 4  ;;  %s28_s22 = sadd.s32 1, %s996_s13  ;;  %s127_s20 = int_to_ptr.vmem [resolvable:$true] %s126_s20 }
   0xb   : > { %s1267_s17 = scalar_select %p1060_p4, 1, 0 }
   0xc   : > { %s1268_s18 = scalar_select %p1064_p5, 1, 0 }
   0xd   : > { %p785_p6 = pneg %p1064_p5  ;;  %s888_s25 = scalar_lea.hbm %s1260_s1, 1024 }
   0xe   : > { %p889_p8 = scmp.ne.s32.totalorder %s1260_s1, %s888_s25  ;;  %p895_p12 = scmp.lt.u32.totalorder %s888_s25, %s1260_s1 }
   0xf   : > { %p1072_p7 = pnand %p785_p6, %p1052_p1 }
  0x11   : > { %p890_p9 = pneg %p1072_p7 }
  0x13   : > { %p891_p10 = pnand %p890_p9, %p889_p8 }
  0x15   : > { %p892_p11 = pneg %p891_p10 }
  0x17   : > { %p897_p13 = pnand %p895_p12, %p892_p11 }
  0x19   : > { %900 = shalt.err (!%p897_p13)
}
  0x1a   : > { %s901_s30 = scalar_lea.vmem %s127_s20, 1024  ;;  %p909_p6 = scmp.lt.s32.totalorder %s127_s20, %s127_s20 }
  0x1b   : > { %p902_p0 = scmp.ne.s32.totalorder %s127_s20, %s901_s30  ;;  %p910_p1 = scmp.lt.s32.totalorder %s901_s30, %s901_s30 }
  0x1d   : > { %p904_p2 = pnand %p902_p0, %p890_p9  ;;  %p911_p4 = por %p910_p1, %p909_p6 }
  0x1f   : > { %p905_p3 = pneg %p904_p2 }
  0x21   : > { %p912_p5 = pnand %p911_p4, %p905_p3 }
  0x23   : > { %915 = shalt.err (!%p912_p5)
}
  0x24   : > { %s1003_s3 = smov 64   ;;  %s1004_s4 = smov 4  }
  0x25   : > { %788 = dma.hbm_to_vmem [thread:$0]  (!%p1072_p7), %s1260_s1, 1024, %s127_s20, [#allocation6], %s1003_s3, %s1003_s3, %s1004_s4  }
  0x26   : > { %p30_p1 = scmp.ge.s32.totalorder %s28_s22, 2  ;;  %s35_s7 = sadd.s32 1, %s988_s11 }
  0x27   : > { %p42_p4 = scmp.ne.s32.totalorder %s988_s11, %s984_s10  ;;  %p43_p5 = scmp.eq.s32.totalorder %s1000_s14, 0 }
  0x28   : > { %s1282_s22 = smov (%p30_p1, %s28_s22), 0  ;;  %p794_p9 = scmp.lt.s32.totalorder %s1000_s14, 2 }
  0x29   : > { %p44_p8 = por %p43_p5, %p42_p4  ;;  %s32_s8 = ssub.s32 %s996_s13, %s1282_s22 }
  0x2a   : > { %s140_s9 = sand.u32 1, %s988_s11   ;;  %p33_p10 = scmp.eq.s32.totalorder %s32_s8, 0 }
  0x2b   : > { %s679_s15 = sshll.u32 %s140_s9, 5  ;;  %s707_s19 = sshll.u32 %s996_s13, 9 }
  0x2c   : > { %s1108_s21 = scalar_select %p33_p10, %s988_s11, %s35_s7  }
  0x2d   : > { %s1113_s20 = scalar_lea.hbm %s1259_s0, %s707_s19  ;;  %s144_s25 = scalar_lea.vmem [#allocation3], %s679_s15 }
  0x2e   : > { %s151_s26 = sshll.u32 %s144_s25, 4  ;;  %p1115_p7 = pnand %p794_p9, %p44_p8  ;;  %s1119_s26 = int_to_ptr.vmem [resolvable:$true] %s151_s26 }
  0x2f   : > { %s1121_s28 = scalar_lea.sflag [#allocation4], %s140_s9  ;;  %s916_s29 = scalar_lea.hbm %s1113_s20, 512 }
  0x30   : > { %p917_p11 = scmp.ne.s32.totalorder %s1113_s20, %s916_s29  ;;  %p918_p12 = pneg %p1115_p7 }
  0x31   : > { %s921_s6 = scalar_lea.hbm %s1259_s0, 1024  ;;  %p922_p2 = scmp.lt.u32.totalorder %s1113_s20, %s1259_s0 }
  0x32   : > { %p919_p13 = pnand %p918_p12, %p917_p11  ;;  %p923_p3 = scmp.lt.u32.totalorder %s921_s6, %s916_s29 }
  0x33   : > { %p925_p1 = scmp.lt.u32.totalorder %s916_s29, %s1113_s20 }
  0x34   : > { %p920_p0 = pneg %p919_p13  ;;  %p924_p6 = por %p923_p3, %p922_p2 }
  0x36   : > { %p926_p4 = por %p925_p1, %p924_p6 }
  0x38   : > { %p927_p5 = pnand %p926_p4, %p920_p0 }
  0x3a   : > { %930 = shalt.err (!%p927_p5)
}
  0x3b   : > { %s931_s9 = scalar_lea.vmem %s1119_s26, 512  ;;  %s1005_s15 = smov [#allocation3]  }
  0x3c   : > { %p932_p8 = scmp.ne.s32.totalorder %s1119_s26, %s931_s9  ;;  %s936_s19 = sshll.u32 %s1005_s15, 4  ;;  %s937_s19 = int_to_ptr.vmem [resolvable:$false] %s936_s19 }
  0x3d   : > { %s938_s23 = scalar_lea.vmem %s937_s19, 1024  ;;  %p939_p11 = scmp.lt.s32.totalorder %s1119_s26, %s937_s19 }
  0x3e   : > { %p934_p9 = pnand %p932_p8, %p918_p12  ;;  %p940_p13 = scmp.lt.s32.totalorder %s938_s23, %s931_s9 }
  0x40   : > { %p935_p10 = pneg %p934_p9  ;;  %p941_p2 = por %p940_p13, %p939_p11 }
  0x42   : > { %p942_p3 = pnand %p941_p2, %p935_p10 }
  0x44   : > { %945 = shalt.err (!%p942_p3)
}
  0x45   : > { %792 = dma.hbm_to_vmem [thread:$0]  (!%p1115_p7), %s1113_s20, 512, %s1119_s26, %s1121_s28, %s1003_s3, %s1003_s3, %s1004_s4  }
  0x46   : > { %p1271_p12 = scmp.ne.s32.totalorder %s1268_s18, 0 }
  0x47   : > { %s165_s24 = sand.u32 (!%p1271_p12), 1, %s984_s10   ;;  %p1272_p0 = scmp.ne.s32.totalorder (!%p1271_p12), %s1267_s17, 0 }
  0x48   : > { %163 = sbr.rel (%p1271_p12) target bundleno = 557 (0x22d), region = 28  ;;  %s683_s25 = sshll.u32 (!%p1271_p12), %s165_s24, 5 }
  0x49   : > { %s166_s29 = scalar_lea.sflag (!%p1271_p12), [#allocation4], %s165_s24  ;;  %s1155_s30 = scalar_lea.vmem (!%p1271_p12), [#allocation3], %s683_s25 }
  0x4f   : > { %971 = dma.done.wait (%p1272_p0), %s166_s29, 512  }
  0x50   : > { %973 = vsyncadd (%p1272_p0), %s166_s29, 4294966784  ;;  %p1273_p6 = scmp.ne.s32.totalorder %s1266_s16, 0 }
  0x52   : > { %975 = dma.done.wait (%p1273_p6), [#allocation6], 1024  }
  0x53   : > { %977 = vsyncadd (%p1273_p6), [#allocation6], 4294966272  ;;  %v848_v0 = vld [vmem:[#allocation5] sm:$0xff]   ;;  %v849_v1 = vld [vmem:[#allocation5 + $0x8] sm:$0xff]   ;;  %vm207_vm0 = vcmask 7168   ;;  %v1006_v32 = vmov 0.0   ;;  %v410_v33 = vlaneseq }
  0x54   : > { %739 = vmatprep.subr.bf16.mxu0 %v848_v0  ;;  %763 = vmatprep.subr.bf16.mxu1 %v848_v0  ;;  %v850_v2 = vld [vmem:[#allocation5 + $0x10] sm:$0xff]   ;;  %v709_v3 = vld [vmem:[%s1155_s30] sm:$0xff]   ;;  %v851_v15 = vld [vmem:[#allocation5 + $0x18] sm:$0xff]   ;;  %210 = vst.msk [vmem:[#allocation2 + $0x10] sm:$0xff] %vm207_vm0, %v1006_v32  ;;  %s703_s16 = sshll.u32 %s992_s12, 6  ;;  %s685_s17 = sshll.u32 %s992_s12, 3 }
  0x55   : > { %740 = vmatpush3.bf16.xpose.msra.mxu0 %v848_v0  ;;  %771 = vmatpush3.bf16.xpose.msra.mxu1 %v848_v0  ;;  %v725_v4 = vld [vmem:[%s1155_s30 + $0x10] sm:$0xff]   ;;  %v710_v5 = vunpack.c.l.bf16 %v709_v3  ;;  %v711_v6 = vunpack.c.h.bf16 %v709_v3  ;;  %v852_v16 = vld [vmem:[#allocation5 + $0x20] sm:$0xff]   ;;  %v853_v17 = vld [vmem:[#allocation5 + $0x28] sm:$0xff]   ;;  %208 = vst.msk [vmem:[#allocation2] sm:$0xff] %vm207_vm0, %v1006_v32  ;;  %v411_v34 = vshrl.u32 %v410_v33, 7  ;;  %v419_v48 = vstv %s703_s16  ;;  %p197_p7 = scmp.lt.s32.totalorder %s685_s17, 15 }
  0x56   : > { %741 = vmatprep.subr.bf16.mxu0 %v849_v1  ;;  %764 = vmatprep.subr.bf16.mxu1 %v849_v1  ;;  %v718_v7 = vunpack.c.l.bf16 %v725_v4  ;;  %v719_v8 = vunpack.c.h.bf16 %v725_v4  ;;  %v854_v18 = vld [vmem:[#allocation5 + $0x30] sm:$0xff]   ;;  %v855_v19 = vld [vmem:[#allocation5 + $0x38] sm:$0xff]   ;;  %v724_v20 = vld [vmem:[%s1155_s30 + $0x8] sm:$0xff]   ;;  %209 = vst.msk [vmem:[#allocation2 + $0x8] sm:$0xff] %vm207_vm0, %v1006_v32  ;;  %v1178_v51 = vand.u32 127, %v410_v33 }
  0x57   : > { %v232_v9 = vmul.f32 2.0, %v710_v5  ;;  %v233_v10 = vmul.f32 2.0, %v711_v6  ;;  %v726_v21 = vld [vmem:[%s1155_s30 + $0x18] sm:$0xff]   ;;  %v714_v22 = vunpack.c.l.bf16 %v724_v20  ;;  %v715_v23 = vunpack.c.h.bf16 %v724_v20  ;;  %211 = vst.msk [vmem:[#allocation2 + $0x18] sm:$0xff] %vm207_vm0, %v1006_v32  ;;  %212 = vst.msk [vmem:[#allocation2 + $0x20] sm:$0xff] %vm207_vm0, %v1006_v32  ;;  %s1284_s17 = smov (!%p197_p7, %s685_s17), 15 }
  0x58   : > { %v236_v11 = vmul.f32 2.0, %v718_v7  ;;  %v237_v12 = vmul.f32 2.0, %v719_v8  ;;  %v722_v24 = vunpack.c.l.bf16 %v726_v21  ;;  %v723_v25 = vunpack.c.h.bf16 %v726_v21  ;;  %213 = vst.msk [vmem:[#allocation2 + $0x28] sm:$0xff] %vm207_vm0, %v1006_v32  ;;  %214 = vst.msk [vmem:[#allocation2 + $0x30] sm:$0xff] %vm207_vm0, %v1006_v32  ;;  %s686_s12 = sshll.u32 %s1284_s17, 3 }
  0x59   : > { %v240_v13 = vpack.c.bf16 %v233_v10, %v232_v9  ;;  %v234_v26 = vmul.f32 2.0, %v714_v22  ;;  %v235_v27 = vmul.f32 2.0, %v715_v23  ;;  %215 = vst.msk [vmem:[#allocation2 + $0x38] sm:$0xff] %vm207_vm0, %v1006_v32  ;;  %v413_v44 = vadd.s32 16, %v411_v34  ;;  %s1223_s4 = scalar_lea.vmem %s1261_s2, %s686_s12 }
  0x5a   : > { %v242_v14 = vpack.c.bf16 %v237_v12, %v236_v11  ;;  %v238_v28 = vmul.f32 2.0, %v722_v24  ;;  %v239_v29 = vmul.f32 2.0, %v723_v25  ;;  %v414_v55 = vadd.s32 24, %v411_v34 }
  0x5b   : > { %755 = vmatprep.mubr.bf16.mxu0 %v240_v13  ;;  %v241_v30 = vpack.c.bf16 %v235_v27, %v234_v26  ;;  %v422_v57 = vadd.s32 %v419_v48, %v413_v44  ;;  %v415_v58 = vadd.s32 32, %v411_v34  ;;  %v420_v61 = vadd.s32 %v419_v48, %v411_v34 }
  0x5c   : > { %759 = vmatprep.mubr.bf16.mxu1 %v242_v14  ;;  %v243_v31 = vpack.c.bf16 %v239_v29, %v238_v28  ;;  %v423_v0 = vadd.s32 %v419_v48, %v414_v55  ;;  %vm440_vm2 = vcmp.lt.s32.totalorder %v1178_v51, 8  ;;  %v412_v4 = vadd.s32 8, %v411_v34  ;;  %v451_v29 = vld [vmem:[#allocation2 + $0x10] sm:$0xff] }
  0x5d   : > { %742 = vmatpush3.bf16.xpose.msra.mxu0 %v849_v1  ;;  %772 = vmatpush3.bf16.xpose.msra.mxu1 %v849_v1  ;;  %vm434_vm1 = vcmp.ne.s32.totalorder %v422_v57, %v1178_v51  ;;  %v424_v1 = vadd.s32 %v419_v48, %v415_v58  ;;  %vm432_vm3 = vcmp.ne.s32.totalorder %v420_v61, %v1178_v51  ;;  %v418_v8 = vadd.s32 56, %v411_v34 }
  0x5e   : > { %743 = vmatprep.subr.bf16.mxu0 %v850_v2  ;;  %765 = vmatprep.subr.bf16.mxu1 %v850_v2  ;;  %vm443_vm4 = vmand %vm434_vm1, %vm440_vm2  ;;  %vm435_vm5 = vcmp.ne.s32.totalorder %v423_v0, %v1178_v51  ;;  %v421_v10 = vadd.s32 %v419_v48, %v412_v4  ;;  %v417_v11 = vadd.s32 48, %v411_v34 }
  0x5f   : > { %vm1188_vm6 = vmand %vm432_vm3, %vm440_vm2  ;;  %vm436_vm7 = vcmp.ne.s32.totalorder %v424_v1, %v1178_v51 }
  0x60   : > { %vm444_vm8 = vmand %vm435_vm5, %vm440_vm2  ;;  %vm433_vm11 = vcmp.ne.s32.totalorder %v421_v10, %v1178_v51 }
  0x61   : > { %vm445_vm9 = vmand %vm436_vm7, %vm440_vm2 }
  0x62   : > { %vm442_vm13 = vmand %vm433_vm11, %vm440_vm2 }
  0x65   : > { %744 = vmatpush3.bf16.xpose.msra.mxu0 %v850_v2  ;;  %773 = vmatpush3.bf16.xpose.msra.mxu1 %v850_v2  ;;  %v416_v2 = vadd.s32 40, %v411_v34 }
  0x66   : > { %745 = vmatprep.subr.bf16.mxu0 %v851_v15  ;;  %766 = vmatprep.subr.bf16.mxu1 %v851_v15 }
  0x67   : > { %v425_v7 = vadd.s32 %v419_v48, %v416_v2 }
  0x69   : > { %vm437_vm10 = vcmp.ne.s32.totalorder %v425_v7, %v1178_v51 }
  0x6a   : > { %vm446_vm12 = vmand %vm437_vm10, %vm440_vm2 }
  0x6d   : > { %746 = vmatpush3.bf16.xpose.msra.mxu0 %v851_v15  ;;  %774 = vmatpush3.bf16.xpose.msra.mxu1 %v851_v15 }
  0x6e   : > { %747 = vmatprep.subr.bf16.mxu0 %v852_v16  ;;  %767 = vmatprep.subr.bf16.mxu1 %v852_v16 }
  0x75   : > { %748 = vmatpush3.bf16.xpose.msra.mxu0 %v852_v16  ;;  %775 = vmatpush3.bf16.xpose.msra.mxu1 %v852_v16  ;;  %v427_v16 = vadd.s32 %v419_v48, %v418_v8 }
  0x76   : > { %749 = vmatprep.subr.bf16.mxu0 %v853_v17  ;;  %768 = vmatprep.subr.bf16.mxu1 %v853_v17 }
  0x77   : > { %vm439_vm14 = vcmp.ne.s32.totalorder %v427_v16, %v1178_v51 }
  0x78   : > { %vm448_vm1 = vmand %vm439_vm14, %vm440_vm2 }
  0x7d   : > { %750 = vmatpush3.bf16.xpose.msra.mxu0 %v853_v17  ;;  %776 = vmatpush3.bf16.xpose.msra.mxu1 %v853_v17 }
  0x7e   : > { %751 = vmatprep.subr.bf16.mxu0 %v854_v18  ;;  %769 = vmatprep.subr.bf16.mxu1 %v854_v18 }
  0x85   : > { %752 = vmatpush3.bf16.xpose.msra.mxu0 %v854_v18  ;;  %777 = vmatpush3.bf16.xpose.msra.mxu1 %v854_v18  ;;  %v426_v18 = vadd.s32 %v419_v48, %v417_v11  ;;  %v456_v48 = vld [vmem:[#allocation2 + $0x38] sm:$0xff] }
  0x86   : > { %753 = vmatprep.subr.bf16.mxu0 %v855_v19  ;;  %770 = vmatprep.subr.bf16.mxu1 %v855_v19 }
  0x87   : > { %vm438_vm15 = vcmp.ne.s32.totalorder %v426_v18, %v1178_v51 }
  0x88   : > { %vm447_vm3 = vmand %vm438_vm15, %vm440_vm2 }
  0x8d   : > { %754 = vmatpush3.bf16.xpose.msra.mxu0 %v855_v19  ;;  %778 = vmatpush3.bf16.xpose.msra.mxu1 %v855_v19 }
  0x94   : > { %756 = vmatmul.mubr.bf16.vlgmr.msra.gmra.mrb[0].mxu0 %v241_v30  ;;  %760 = vmatmul.mubr.bf16.vlgmr.msra.gmra.mrb[0].mxu1 %v243_v31  ;;  %v449_v30 = vld [vmem:[#allocation2] sm:$0xff] }
 0x167   : > { %v757_v35 = vpop.f32.mrb[0].mxu0  ;;  %v761_v36 = vpop.f32.mrb[0].mxu1 }
 0x168   : > { %v697_v37 = vadd.f32 -2.0, %v757_v35  ;;  %v342_v38 = vpop.f32.mrb[1].mxu0  ;;  %v358_v39 = vpop.f32.mrb[1].mxu1  ;;  %v701_v62 = vadd.f32 -2.0, %v761_v36  ;;  %v452_v35 = vld [vmem:[#allocation2 + $0x18] sm:$0xff]  ;;  %v453_v36 = vld [vmem:[#allocation2 + $0x20] sm:$0xff] }
 0x169   : > { %v695_v40 = vadd.f32 -2.0, %v342_v38  ;;  %v758_v41 = vpop.f32.mrb[2].mxu0  ;;  %v699_v42 = vadd.f32 -2.0, %v358_v39  ;;  %v762_v43 = vpop.f32.mrb[2].mxu1 }
 0x16a   : > { %v385_v45 = vmul.f32 1.442695, %v697_v37  ;;  %v698_v46 = vadd.f32 -2.0, %v758_v41  ;;  %v345_v47 = vpop.f32.mrb[3].mxu0  ;;  %v361_v54 = vpop.f32.mrb[3].mxu1  ;;  %v702_v60 = vadd.f32 -2.0, %v762_v43 }
 0x16b   : > { %v381_v49 = vmul.f32 1.442695, %v695_v40  ;;  %v696_v50 = vadd.f32 -2.0, %v345_v47  ;;  %v389_v53 = vmul.f32 1.442695, %v699_v42  ;;  %v700_v56 = vadd.f32 -2.0, %v361_v54 }
 0x16c   : > { %856 = vpow2.f32 %v385_v45  ;;  %v387_v52 = vmul.f32 1.442695, %v698_v46  ;;  %v395_v3 = vmul.f32 1.442695, %v702_v60  ;;  %v393_v5 = vmul.f32 1.442695, %v701_v62 }
 0x16d   : > { %858 = vpow2.f32 %v381_v49  ;;  %v383_v59 = vmul.f32 1.442695, %v696_v50  ;;  %v391_v63 = vmul.f32 1.442695, %v700_v56  ;;  %v454_v41 = vld [vmem:[#allocation2 + $0x28] sm:$0xff]  ;;  %v455_v50 = vld [vmem:[#allocation2 + $0x30] sm:$0xff] }
 0x16e   : > { %860 = vpow2.f32 %v387_v52  ;;  %v450_v42 = vld [vmem:[#allocation2 + $0x8] sm:$0xff] }
 0x16f   : > { %862 = vpow2.f32 %v389_v53 }
 0x170   : > { %864 = vpow2.f32 %v383_v59 }
 0x171   : > { %866 = vpow2.f32 %v391_v63 }
 0x172   : > { %868 = vpow2.f32 %v395_v3 }
 0x173   : > { %870 = vpow2.f32 %v393_v5 }
 0x176   : > { %v857_v9 = vpop.eup %856 }
 0x177   : > { %v859_v12 = vpop.eup %858  ;;  %v459_v13 = vsel %vm443_vm4, %v857_v9, 0.0 }
 0x178   : > { %469 = vadd.xlane.f32.xlu1 %v459_v13  ;;  %v457_v14 = vsel %vm1188_vm6, %v859_v12, 0.0  ;;  %v861_v15 = vpop.eup %860 }
 0x179   : > { %465 = vadd.xlane.f32.xlu0 %v457_v14  ;;  %v863_v17 = vpop.eup %862  ;;  %v460_v19 = vsel %vm444_vm8, %v861_v15, 0.0 }
 0x17a   : > { %v461_v20 = vsel %vm445_vm9, %v863_v17, 0.0  ;;  %v865_v21 = vpop.eup %864 }
 0x17b   : > { %v867_v22 = vpop.eup %866  ;;  %v458_v25 = vsel %vm442_vm13, %v865_v21, 0.0 }
 0x17c   : > { %471 = vadd.xlane.f32.xlu1 %v460_v19  ;;  %v462_v23 = vsel %vm446_vm12, %v867_v22, 0.0  ;;  %v869_v24 = vpop.eup %868 }
 0x17d   : > { %473 = vadd.xlane.f32.xlu0 %v461_v20  ;;  %v871_v26 = vpop.eup %870  ;;  %v464_v27 = vsel %vm448_vm1, %v869_v24, 0.0 }
 0x17e   : > { %v463_v28 = vsel %vm447_vm3, %v871_v26, 0.0 }
 0x180   : > { %475 = vadd.xlane.f32.xlu1 %v462_v23 }
 0x181   : > { %467 = vadd.xlane.f32.xlu0 %v458_v25 }
 0x184   : > { %479 = vadd.xlane.f32.xlu1 %v464_v27 }
 0x185   : > { %477 = vadd.xlane.f32.xlu0 %v463_v28 }
 0x205   : > { %v470_v31 = vpop.xlane.xlu1 %469 }
 0x206   : > { %v483_v32 = vadd.f32 %v470_v31, %v451_v29  ;;  %v466_v33 = vpop.xlane.xlu0 %465 }
 0x207   : > { %v481_v34 = vadd.f32 %v466_v33, %v449_v30 }
 0x208   : > { %492 = vst.msk [vmem:[#allocation2 + $0x10] sm:$0xff] %vm207_vm0, %v483_v32 }
 0x209   : > { %490 = vst.msk [vmem:[#allocation2] sm:$0xff] %vm207_vm0, %v481_v34  ;;  %v472_v37 = vpop.xlane.xlu1 %471 }
 0x20a   : > { %v484_v38 = vadd.f32 %v472_v37, %v452_v35  ;;  %v474_v39 = vpop.xlane.xlu0 %473 }
 0x20b   : > { %v485_v40 = vadd.f32 %v474_v39, %v453_v36 }
 0x20c   : > { %493 = vst.msk [vmem:[#allocation2 + $0x18] sm:$0xff] %vm207_vm0, %v484_v38 }
 0x20d   : > { %494 = vst.msk [vmem:[#allocation2 + $0x20] sm:$0xff] %vm207_vm0, %v485_v40  ;;  %v476_v43 = vpop.xlane.xlu1 %475 }
 0x20e   : > { %v486_v44 = vadd.f32 %v476_v43, %v454_v41  ;;  %v468_v45 = vpop.xlane.xlu0 %467 }
 0x20f   : > { %v547_v46 = vld [vmem:[#allocation2 + $0x10] sm:$0xff]  ;;  %v482_v47 = vadd.f32 %v468_v45, %v450_v42 }
 0x210   : > { %872 = vlog2.f32 %v547_v46  ;;  %v545_v49 = vld [vmem:[#allocation2] sm:$0xff]  ;;  %495 = vst.msk [vmem:[#allocation2 + $0x28] sm:$0xff] %vm207_vm0, %v486_v44 }
 0x211   : > { %874 = vlog2.f32 %v545_v49  ;;  %491 = vst.msk [vmem:[#allocation2 + $0x8] sm:$0xff] %vm207_vm0, %v482_v47  ;;  %v480_v51 = vpop.xlane.xlu1 %479 }
 0x212   : > { %v488_v52 = vadd.f32 %v480_v51, %v456_v48  ;;  %v478_v53 = vpop.xlane.xlu0 %477 }
 0x213   : > { %v548_v54 = vld [vmem:[#allocation2 + $0x18] sm:$0xff]  ;;  %v487_v55 = vadd.f32 %v478_v53, %v455_v50 }
 0x214   : > { %876 = vlog2.f32 %v548_v54  ;;  %v549_v56 = vld [vmem:[#allocation2 + $0x20] sm:$0xff]  ;;  %497 = vst.msk [vmem:[#allocation2 + $0x38] sm:$0xff] %vm207_vm0, %v488_v52 }
 0x215   : > { %878 = vlog2.f32 %v549_v56  ;;  %496 = vst.msk [vmem:[#allocation2 + $0x30] sm:$0xff] %vm207_vm0, %v487_v55 }
 0x217   : > { %v550_v57 = vld [vmem:[#allocation2 + $0x28] sm:$0xff] }
 0x218   : > { %880 = vlog2.f32 %v550_v57  ;;  %v546_v58 = vld [vmem:[#allocation2 + $0x8] sm:$0xff] }
 0x219   : > { %882 = vlog2.f32 %v546_v58 }
 0x21a   : > { %v873_v59 = vpop.eup %872 }
 0x21b   : > { %v875_v60 = vpop.eup %874  ;;  %v558_v61 = vmul.f32 0.6931472, %v873_v59  ;;  %v552_v62 = vld [vmem:[#allocation2 + $0x38] sm:$0xff] }
 0x21c   : > { %v554_v63 = vmul.f32 0.6931472, %v875_v60  ;;  %884 = vlog2.f32 %v552_v62  ;;  %v551_v0 = vld [vmem:[#allocation2 + $0x30] sm:$0xff] }
 0x21d   : > { %v571_v1 = vadd.f32 2.0, %v558_v61  ;;  %886 = vlog2.f32 %v551_v0 }
 0x21e   : > { %v877_v2 = vpop.eup %876  ;;  %v569_v3 = vadd.f32 2.0, %v554_v63 }
 0x21f   : > { %v879_v4 = vpop.eup %878  ;;  %580 = vst.msk [vmem:[%s1223_s4 + $0x10] sm:$0xff] %vm207_vm0, %v571_v1  ;;  %v560_v5 = vmul.f32 0.6931472, %v877_v2 }
 0x220   : > { %578 = vst.msk [vmem:[%s1223_s4] sm:$0xff] %vm207_vm0, %v569_v3  ;;  %v562_v6 = vmul.f32 0.6931472, %v879_v4 }
 0x221   : > { %v572_v7 = vadd.f32 2.0, %v560_v5 }
 0x222   : > { %v881_v8 = vpop.eup %880  ;;  %v573_v9 = vadd.f32 2.0, %v562_v6 }
 0x223   : > { %v883_v10 = vpop.eup %882  ;;  %581 = vst.msk [vmem:[%s1223_s4 + $0x18] sm:$0xff] %vm207_vm0, %v572_v7  ;;  %v564_v11 = vmul.f32 0.6931472, %v881_v8 }
 0x224   : > { %582 = vst.msk [vmem:[%s1223_s4 + $0x20] sm:$0xff] %vm207_vm0, %v573_v9  ;;  %v556_v12 = vmul.f32 0.6931472, %v883_v10 }
 0x225   : > { %v574_v13 = vadd.f32 2.0, %v564_v11 }
 0x226   : > { %v885_v14 = vpop.eup %884  ;;  %v570_v15 = vadd.f32 2.0, %v556_v12 }
 0x227   : > { %v887_v16 = vpop.eup %886  ;;  %583 = vst.msk [vmem:[%s1223_s4 + $0x28] sm:$0xff] %vm207_vm0, %v574_v13  ;;  %v568_v17 = vmul.f32 0.6931472, %v885_v14 }
 0x228   : > { %579 = vst.msk [vmem:[%s1223_s4 + $0x8] sm:$0xff] %vm207_vm0, %v570_v15  ;;  %v566_v18 = vmul.f32 0.6931472, %v887_v16 }
 0x229   : > { %v576_v19 = vadd.f32 2.0, %v568_v17 }
 0x22a   : > { %v575_v20 = vadd.f32 2.0, %v566_v18 }
 0x22b   : > { %585 = vst.msk [vmem:[%s1223_s4 + $0x38] sm:$0xff] %vm207_vm0, %v576_v19 }
 0x22c   : > { %584 = vst.msk [vmem:[%s1223_s4 + $0x30] sm:$0xff] %vm207_vm0, %v575_v20 }
 0x22d PF: > { %s16_s14 = sadd.s32 1, %s1000_s14   ;;  %s1276_s9 = smov %s984_s10 }
 0x22e   : > { %p13_p1 = scmp.ge.s32.totalorder %s16_s14, 4   ;;  %s1277_s10 = smov %s988_s11 }
 0x22f   : > { %s1278_s11 = smov %s1108_s21  ;;  %s1279_s12 = smov %s996_s13 }
 0x230   : > { %s1280_s13 = smov %s1282_s22  ;;  %15 = sbr.rel (!%p13_p1) target bundleno = 5 (0x5), region = 89 }
 0x237   :  { %608 = vsyncpa [#allocation4], 1 }
 0x238   :  { %610 = vsyncpa [#allocation4 + $0x1], 1 }
 0x239   :  { %611 = vsyncpa [#allocation6], 1 }

</bundles_post_ra>
